<compile_context>
chip_gen: v5e
topology: v5e:2x2
jax: 0.10.0
libtpu: 0.0.40
codegen_flags: <defaults>
</compile_context>

<pallas_src>
import functools

import jax
import jax.numpy as jnp
from jax.experimental import pallas as pl
from jax.experimental.pallas import tpu as pltpu


# ----------------------------------------------------------------------------
# Hardware-aware sizing helpers
# ----------------------------------------------------------------------------
def _tpu_vmem_and_cores():
    """Best-effort query of per-core VMEM bytes and TensorCores per chip."""
    vmem = 64 << 20   # conservative default (v7x-class)
    cores = 1
    try:
        info = pltpu.get_tpu_info()
        vmem = int(getattr(info, "vmem_capacity_bytes", vmem))
        for attr in ("num_tensorcores", "tensorcores_per_chip",
                     "cores_per_chip", "num_cores"):
            v = getattr(info, attr, None)
            if isinstance(v, int) and v > 0:
                cores = v
                break
    except Exception:
        pass
    return vmem, cores


def _pick_batch_block(n, bytes_per_sample, target_bytes, cores):
    """Largest divisor of n whose block fits the byte target; prefer a block
    count that is a multiple of the TensorCore count (v7x megacore)."""
    cap = max(1, min(n, target_bytes // max(1, bytes_per_sample)))
    nb = 1
    for d in range(cap, 0, -1):
        if n % d == 0:
            nb = d
            break
    if cores > 1 and n >= cores:
        for d in range(nb, 0, -1):
            if n % d == 0 and (n // d) % cores == 0:
                nb = d
                break
    return nb


def _vmem_limit_bytes(block_bytes, vmem_budget):
    # 2x(in) + 2x(out) double-buffering + weights / intermediates headroom.
    lim = max(4 * block_bytes + (4 << 20), 16 << 20)
    return int(min(lim, vmem_budget))


# ----------------------------------------------------------------------------
# Kernels
# ----------------------------------------------------------------------------
def _se_single_pass_kernel(x_ref, w1t_ref, w2t_ref, o_ref, *, inv_hw):
    x = x_ref[...]                                            # (Nb, C, HW), native dtype

    # squeeze: global average pool; accumulate in f32 without materializing
    # the whole tile in f32.
    z = jnp.sum(x, axis=-1, dtype=jnp.float32) * inv_hw       # (Nb, C)

    # excitation: 1x1 convs == two tiny lane-dense MXU matmuls (weights are
    # already f32, pre-cast once in the wrapper).
    h = jnp.maximum(
        jnp.dot(z, w1t_ref[...], preferred_element_type=jnp.float32), 0.0)
    s = jax.nn.sigmoid(
        jnp.dot(h, w2t_ref[...], preferred_element_type=jnp.float32))

    # rescale in the input dtype: only the tiny (Nb, C) scale is cast.
    o_ref[...] = s.astype(o_ref.dtype)[:, :, None] * x


def _se_reduce_excite_kernel(x_ref, w1t_ref, w2t_ref, s_ref, acc_ref,
                             *, inv_hw, hw, thw):
    """Pass 1 of the HW-tiled path: accumulate per-channel sums over HW tiles
    and emit the sigmoid excitation scale for each sample."""
    t = pl.program_id(1)

    @pl.when(t == 0)
    def _():
        acc_ref[...] = jnp.zeros_like(acc_ref)

    x = x_ref[...]                                            # (Nb, C, THW)
    if hw % thw != 0:
        # Ragged last HW tile: zero out lanes past the true spatial extent.
        lane = jax.lax.broadcasted_iota(jnp.int32, x.shape, 2) + t * thw
        x = jnp.where(lane < hw, x, 0)
    acc_ref[...] += jnp.sum(x, axis=-1, dtype=jnp.float32)

    # The excitation is recomputed every HW tile (it is tiny and hidden under
    # the block DMA); only the value written on the last tile, where acc_ref
    # holds the full sum, survives the output writeback for this sample block.
    z = acc_ref[...] * inv_hw                                  # (Nb, C) f32
    h = jnp.maximum(
        jnp.dot(z, w1t_ref[...], preferred_element_type=jnp.float32), 0.0)
    s = jax.nn.sigmoid(
        jnp.dot(h, w2t_ref[...], preferred_element_type=jnp.float32))
    s_ref[...] = s[:, None, :]                                 # (Nb, 1, C)


def _se_rescale_kernel(x_ref, s_ref, o_ref):
    """Pass 2 of the HW-tiled path: y = scale * x."""
    s = s_ref[...][:, 0, :]                                    # (Nb, C) f32
    o_ref[...] = s.astype(o_ref.dtype)[:, :, None] * x_ref[...]


# ----------------------------------------------------------------------------
# Wrapper
# ----------------------------------------------------------------------------
def se_block_2d(x, w1, w2, *, force_two_pass=False, hw_tile=None):
    """x: (N, C, H, W) NCHW, w1: (C//r, C), w2: (C, C//r)."""
    N, C, H, W = x.shape
    Cr = w1.shape[0]
    HW = H * W
    itemsize = jnp.dtype(x.dtype).itemsize

    vmem_cap, cores = _tpu_vmem_and_cores()
    vmem_budget = (vmem_cap * 7) // 10
    # Generation-aware block target: ~8 MiB on 128 MiB-VMEM parts (v5e/v6e),
    # ~5 MiB on 64 MiB-VMEM parts (v7x).
    target_block_bytes = (8 << 20) if vmem_cap >= (96 << 20) else (5 << 20)

    per_sample = C * HW * itemsize
    single_pass = (not force_two_pass) and (
        4 * per_sample + (4 << 20) <= vmem_budget)

    # Pre-transpose + pre-cast weights once in the wrapper so both excitation
    # matmuls are (rows, K) x (K, lanes) with lane-dense outputs and no
    # per-grid-step casts inside the kernel.
    w1t = jnp.asarray(w1).T.astype(jnp.float32)   # (C, Cr)
    w2t = jnp.asarray(w2).T.astype(jnp.float32)   # (Cr, C)

    xr = x.reshape(N, C, HW)                       # free (contiguous) reshape

    cost = pl.CostEstimate(
        flops=2 * N * C * HW + 4 * N * C * Cr,
        transcendentals=N * C,
        bytes_accessed=2 * N * C * HW * itemsize + 2 * C * Cr * 4,
    )

    if single_pass:
        # ---- single pass: one read of x, one write of y, no padding -------
        Nb = _pick_batch_block(N, per_sample, target_block_bytes, cores)
        n_blocks = N // Nb
        block_bytes = Nb * per_sample
        out = pl.pallas_call(
            functools.partial(_se_single_pass_kernel, inv_hw=1.0 / HW),
            out_shape=jax.ShapeDtypeStruct((N, C, HW), x.dtype),
            grid_spec=pltpu.PrefetchScalarGridSpec(
                num_scalar_prefetch=0,
                grid=(n_blocks,),
                in_specs=[
                    pl.BlockSpec((Nb, C, HW), lambda n: (n, 0, 0)),
                    pl.BlockSpec((C, Cr), lambda n: (0, 0)),
                    pl.BlockSpec((Cr, C), lambda n: (0, 0)),
                ],
                out_specs=pl.BlockSpec((Nb, C, HW), lambda n: (n, 0, 0)),
            ),
            compiler_params=pltpu.CompilerParams(
                dimension_semantics=("parallel",),
                vmem_limit_bytes=_vmem_limit_bytes(block_bytes, vmem_budget),
            ),
            cost_estimate=cost,
        )(xr, w1t, w2t)
        return out.reshape(N, C, H, W)

    # ---- two-pass HW-tiled path (per-sample slab too big for VMEM) --------
    if hw_tile is None:
        thw = 128 * max(1, target_block_bytes // (C * 128 * itemsize))
    else:
        thw = int(hw_tile)
    if thw >= HW:
        thw = HW                                   # full extent is always legal
    n_hw = pl.cdiv(HW, thw)

    per_block_sample = C * thw * itemsize
    Nb = _pick_batch_block(N, per_block_sample, target_block_bytes, cores)
    n_blocks = N // Nb
    block_bytes = Nb * per_block_sample
    vmem_limit = _vmem_limit_bytes(block_bytes, vmem_budget)

    # Pass 1: reduce HW tiles -> per-sample channel means -> excitation scale.
    scale = pl.pallas_call(
        functools.partial(_se_reduce_excite_kernel,
                          inv_hw=1.0 / HW, hw=HW, thw=thw),
        out_shape=jax.ShapeDtypeStruct((N, 1, C), jnp.float32),
        grid_spec=pltpu.PrefetchScalarGridSpec(
            num_scalar_prefetch=0,
            grid=(n_blocks, n_hw),
            in_specs=[
                pl.BlockSpec((Nb, C, thw), lambda n, t: (n, 0, t)),
                pl.BlockSpec((C, Cr), lambda n, t: (0, 0)),
                pl.BlockSpec((Cr, C), lambda n, t: (0, 0)),
            ],
            out_specs=pl.BlockSpec((Nb, 1, C), lambda n, t: (n, 0, 0)),
            scratch_shapes=[pltpu.VMEM((Nb, C), jnp.float32)],
        ),
        compiler_params=pltpu.CompilerParams(
            dimension_semantics=("parallel", "arbitrary"),
            vmem_limit_bytes=vmem_limit,
        ),
    )(xr, w1t, w2t)

    # Pass 2: y = scale * x over the same HW tiles.
    out = pl.pallas_call(
        _se_rescale_kernel,
        out_shape=jax.ShapeDtypeStruct((N, C, HW), x.dtype),
        grid_spec=pltpu.PrefetchScalarGridSpec(
            num_scalar_prefetch=0,
            grid=(n_blocks, n_hw),
            in_specs=[
                pl.BlockSpec((Nb, C, thw), lambda n, t: (n, 0, t)),
                pl.BlockSpec((Nb, 1, C), lambda n, t: (n, 0, 0)),
            ],
            out_specs=pl.BlockSpec((Nb, C, thw), lambda n, t: (n, 0, t)),
        ),
        compiler_params=pltpu.CompilerParams(
            dimension_semantics=("parallel", "parallel"),
            vmem_limit_bytes=vmem_limit,
        ),
        cost_estimate=cost,
    )(xr, scale)
    return out.reshape(N, C, H, W)


def se_block_2d_ref(x, w1, w2):
    # pure-JAX reference matching the PyTorch forward
    z = jnp.mean(x, axis=(2, 3), keepdims=True)          # (N, C, 1, 1)
    h = jnp.einsum('oc,nchw->nohw', w1, z)                # conv1 1x1, no bias
    h = jnp.maximum(h, 0.0)                               # ReLU
    s = jnp.einsum('oc,nchw->nohw', w2, h)                # conv2 1x1, no bias
    s = jax.nn.sigmoid(s)
    return s * x


if __name__ == "__main__":
    key = jax.random.PRNGKey(0)
    N, C, H, W = 2, 64, 16, 16
    r = 16
    Cr = C // r

    kx, k1, k2 = jax.random.split(key, 3)
    x = jax.random.normal(kx, (N, C, H, W), dtype=jnp.float32)
    # deterministic synthetic 1x1-conv weights (kaiming-uniform-ish scale)
    w1 = jax.random.uniform(k1, (Cr, C), jnp.float32, -1.0, 1.0) * (1.0 / (C ** 0.5))
    w2 = jax.random.uniform(k2, (C, Cr), jnp.float32, -1.0, 1.0) * (1.0 / (Cr ** 0.5))

    y_ref = se_block_2d_ref(x, w1, w2)

    # Main (single-pass) path.
    y = jax.block_until_ready(se_block_2d(x, w1, w2))
    assert y.shape == (N, C, H, W)
    assert jnp.allclose(y, y_ref, atol=1e-5, rtol=1e-5)

    # Also exercise the HW-tiled two-pass path (used when a per-sample slab
    # does not fit the VMEM budget, e.g. large feature maps on v7x).
    y2 = jax.block_until_ready(
        se_block_2d(x, w1, w2, force_two_pass=True, hw_tile=128))
    assert jnp.allclose(y2, y_ref, atol=1e-5, rtol=1e-5)

    print("KERNEL_OK")
</pallas_src>

<mosaic_0001>
module attributes {stable_mosaic.version = 11 : i64} {
  func.func @_se_single_pass_kernel(%arg0: i32, %arg1: memref<2x64x256xf32, #tpu.memory_space<vmem>>, %arg2: memref<64x4xf32, #tpu.memory_space<vmem>>, %arg3: memref<4x64xf32, #tpu.memory_space<vmem>>, %arg4: memref<2x64x256xf32, #tpu.memory_space<vmem>>) attributes {dimension_semantics = [#tpu.dimension_semantics<parallel>], iteration_bounds = array<i64: 1>, scalar_prefetch = 0 : i64, scratch_operands = 0 : i64, tpu.core_type = #tpu.core_type<tc>, window_params = [{transform_indices = @transform_0, window_bounds = array<i64: 2, 64, 256>}, {pipeline_mode = #tpu.pipeline_mode<synchronous>, transform_indices = @transform_1, window_bounds = array<i64: 64, 4>}, {pipeline_mode = #tpu.pipeline_mode<synchronous>, transform_indices = @transform_2, window_bounds = array<i64: 4, 64>}, {transform_indices = @transform_3, window_bounds = array<i64: 2, 64, 256>}]} {
    %c0 = arith.constant 0 : index
    %c0_0 = arith.constant 0 : index
    %c0_1 = arith.constant 0 : index
    %0 = vector.load %arg1[%c0, %c0_0, %c0_1] : memref<2x64x256xf32, #tpu.memory_space<vmem>>, vector<2x64x256xf32>
    %cst = arith.constant dense<0.000000e+00> : vector<2x64xf32>
    %1 = vector.multi_reduction <add>, %0, %cst [2] : vector<2x64x256xf32> to vector<2x64xf32>
    %cst_2 = arith.constant 3.906250e-03 : f32
    %2 = vector.broadcast %cst_2 : f32 to vector<2x64xf32>
    %3 = arith.mulf %1, %2 : vector<2x64xf32>
    %c0_3 = arith.constant 0 : index
    %c0_4 = arith.constant 0 : index
    %4 = vector.load %arg2[%c0_3, %c0_4] : memref<64x4xf32, #tpu.memory_space<vmem>>, vector<64x4xf32>
    %cst_5 = arith.constant dense<0.000000e+00> : vector<2x4xf32>
    %5 = tpu.matmul %3, %4, %cst_5 {dimension_numbers = #tpu.dot_dimension_numbers<[1], [0], [0], [1], [0, 0, 1, 1], [], []>} : vector<2x64xf32>, vector<64x4xf32>, vector<2x4xf32> -> vector<2x4xf32>
    %cst_6 = arith.constant 0.000000e+00 : f32
    %6 = vector.broadcast %cst_6 : f32 to vector<2x4xf32>
    %7 = arith.maximumf %5, %6 : vector<2x4xf32>
    %c0_7 = arith.constant 0 : index
    %c0_8 = arith.constant 0 : index
    %8 = vector.load %arg3[%c0_7, %c0_8] : memref<4x64xf32, #tpu.memory_space<vmem>>, vector<4x64xf32>
    %cst_9 = arith.constant dense<0.000000e+00> : vector<2x64xf32>
    %9 = tpu.matmul %7, %8, %cst_9 {dimension_numbers = #tpu.dot_dimension_numbers<[1], [0], [0], [1], [0, 0, 1, 1], [], []>} : vector<2x4xf32>, vector<4x64xf32>, vector<2x64xf32> -> vector<2x64xf32>
    %10 = arith.negf %9 : vector<2x64xf32>
    %11 = math.exp %10 : vector<2x64xf32>
    %cst_10 = arith.constant 1.000000e+00 : f32
    %12 = vector.broadcast %cst_10 : f32 to vector<2x64xf32>
    %13 = arith.addf %12, %11 : vector<2x64xf32>
    %14 = arith.divf %12, %13 : vector<2x64xf32>
    %15 = vector.shape_cast %14 : vector<2x64xf32> to vector<2x64x1xf32>
    %16 = vector.broadcast %15 : vector<2x64x1xf32> to vector<2x64x256xf32>
    %17 = arith.mulf %16, %0 : vector<2x64x256xf32>
    %c0_11 = arith.constant 0 : index
    %c0_12 = arith.constant 0 : index
    %c0_13 = arith.constant 0 : index
    %18 = vector.load %arg4[%c0_11, %c0_12, %c0_13] : memref<2x64x256xf32, #tpu.memory_space<vmem>>, vector<2x64x256xf32>
    tpu.vector_store %arg4[%c0_11, %c0_12, %c0_13], %17 {strides = array<i32>} : memref<2x64x256xf32, #tpu.memory_space<vmem>>, vector<2x64x256xf32>,
    return
  }
  func.func @transform_0(%arg0: i32) -> (i32, i32, i32) {
    %c0_i32 = arith.constant 0 : i32
    %c0_i32_0 = arith.constant 0 : i32
    %c0_i32_1 = arith.constant 0 : i32
    return %arg0, %c0_i32, %c0_i32_0 : i32, i32, i32
  }
  func.func @transform_1(%arg0: i32) -> (i32, i32) {
    %c0_i32 = arith.constant 0 : i32
    %c0_i32_0 = arith.constant 0 : i32
    %c0_i32_1 = arith.constant 0 : i32
    return %c0_i32, %c0_i32_0 : i32, i32
  }
  func.func @transform_2(%arg0: i32) -> (i32, i32) {
    %c0_i32 = arith.constant 0 : i32
    %c0_i32_0 = arith.constant 0 : i32
    %c0_i32_1 = arith.constant 0 : i32
    return %c0_i32, %c0_i32_0 : i32, i32
  }
  func.func @transform_3(%arg0: i32) -> (i32, i32, i32) {
    %c0_i32 = arith.constant 0 : i32
    %c0_i32_0 = arith.constant 0 : i32
    %c0_i32_1 = arith.constant 0 : i32
    return %arg0, %c0_i32, %c0_i32_0 : i32, i32, i32
  }
}

</mosaic_0001>

<bundles_post_ra>
// kernel: tpu_custom_call.1
= control target key start
LH: loop header
LB: loop body
LE: loop exit
PB: predicated region body
PF: predicated region fallthrough
CT: control target
= control target key end

     0   :  { %8 = vsyncpa [#allocation3], 0  ;;  %s734_s0 = inlined_call_operand.hbm [shape: f32[2,64,256], index: 0, kind: input, shape index: {}]   ;;  %s735_s1 = inlined_call_operand.vmem [shape: f32[64,4], index: 1, kind: input, shape index: {}]   ;;  %s736_s2 = inlined_call_operand.vmem [shape: f32[4,64], index: 2, kind: input, shape index: {}]   ;;  %s737_s3 = inlined_call_operand.hbm [shape: f32[2,64,256], index: 3, kind: output, shape index: {}]  }
   0x1   :  { %9 = vsyncpa [#allocation4], 0  ;;  %s14_s14 = sshll.u32 %s734_s0, 4  ;;  %s533_s15 = smov [#allocation2]   ;;  %s15_s14 = int_to_ptr.hbm [resolvable:$true] %s14_s14 }
   0x2   :  { %s16_s16 = sshll.u32 %s533_s15, 4  ;;  %s534_s17 = smov 256   ;;  %s17_s16 = int_to_ptr.vmem [resolvable:$true] %s16_s16 }
   0x3   :  { %s535_s18 = smov 16  }
   0x4   :  { %22 = dma.hbm_to_vmem [thread:$0]  %s15_s14, 4096, %s17_s16, [#allocation3], %s534_s17, %s534_s17, %s535_s18  }
   0x5   :  { %529 = dma.done.wait [#allocation3], 4096  }
   0x6   :  { %530 = vsyncadd [#allocation3], 4294963200  ;;  %v563_v0 = vld [vmem:[#allocation2 + $0x80] sm:$0xff]  ;;  %v565_v1 = vld [vmem:[#allocation2 + $0x88] sm:$0xff]  ;;  %vm156_vm0 = vcmask 130112   ;;  %vm160_vm1 = vcmask 195712  }
   0x7   :  { %v567_v2 = vld [vmem:[#allocation2] sm:$0xff]  ;;  %v87_v3 = vadd.f32 %v565_v1, %v563_v0  ;;  %v571_v4 = vld [vmem:[#allocation2 + $0x8] sm:$0xff]  ;;  %v581_v9 = vld [vmem:[#allocation2 + $0x90] sm:$0xff]  ;;  %vm164_vm2 = vcmask 261312   ;;  %vm168_vm3 = vcmask 326912   ;;  %vm172_vm4 = vcmask 392512  }
   0x8   :  { %v573_v5 = vld [vmem:[#allocation2 + $0x20] sm:$0xff]  ;;  %v575_v6 = vld [vmem:[#allocation2 + $0x28] sm:$0xff]  ;;  %v63_v7 = vadd.f32 %v571_v4, %v567_v2  ;;  %v583_v10 = vld [vmem:[#allocation2 + $0x98] sm:$0xff]  ;;  %vm176_vm5 = vcmask 458112   ;;  %vm180_vm6 = vcmask 523712   ;;  %vm197_vm7 = vcmask 1041409  }
   0x9   :  { %v69_v8 = vadd.f32 %v575_v6, %v573_v5  ;;  %88 = vadd.xlane.f32.xlu1 %v87_v3  ;;  %v585_v11 = vld [vmem:[#allocation2 + $0x10] sm:$0xff]  ;;  %v587_v12 = vld [vmem:[#allocation2 + $0x18] sm:$0xff]  ;;  %v589_v13 = vld [vmem:[#allocation2 + $0xa0] sm:$0xff]  ;;  %v90_v15 = vadd.f32 %v583_v10, %v581_v9  ;;  %vm199_vm8 = vcmask 523264   ;;  %vm228_vm9 = vcmask 1043456   ;;  %s439_s11 = sshll.u32 %s737_s3, 4  ;;  %s440_s11 = int_to_ptr.hbm [resolvable:$true] %s439_s11 }
   0xa   :  { %64 = vadd.xlane.f32.xlu0 %v63_v7  ;;  %v591_v14 = vld [vmem:[#allocation2 + $0xa8] sm:$0xff]  ;;  %v66_v16 = vadd.f32 %v587_v12, %v585_v11  ;;  %v599_v18 = vld [vmem:[#allocation2 + $0xb0] sm:$0xff]  ;;  %v601_v19 = vld [vmem:[#allocation2 + $0xb8] sm:$0xff]  ;;  %v738_v7 = vlaneseq  ;;  %vm224_vm10 = vcmask 31744  }
   0xb   :  { %70 = vadd.xlane.f32.xlu2 %v69_v8  ;;  %v93_v17 = vadd.f32 %v591_v14, %v589_v13  ;;  %v603_v20 = vld [vmem:[#allocation2 + $0x30] sm:$0xff]  ;;  %v605_v21 = vld [vmem:[#allocation2 + $0x38] sm:$0xff]  ;;  %v607_v22 = vld [vmem:[#allocation2 + $0x40] sm:$0xff]  ;;  %v96_v24 = vadd.f32 %v601_v19, %v599_v18 }
   0xc   :  { %v609_v23 = vld [vmem:[#allocation2 + $0x48] sm:$0xff]  ;;  %v72_v25 = vadd.f32 %v605_v21, %v603_v20  ;;  %v617_v27 = vld [vmem:[#allocation2 + $0x50] sm:$0xff]  ;;  %v619_v28 = vld [vmem:[#allocation2 + $0x58] sm:$0xff]  ;;  %v152_v8 = vand.u32 127, %v738_v7 }
   0xd   :  { %v75_v26 = vadd.f32 %v609_v23, %v607_v22  ;;  %v621_v29 = vld [vmem:[#allocation2 + $0xc0] sm:$0xff]  ;;  %v623_v30 = vld [vmem:[#allocation2 + $0xc8] sm:$0xff]  ;;  %v625_v31 = vld [vmem:[#allocation2 + $0xd0] sm:$0xff]  ;;  %v78_v33 = vadd.f32 %v619_v28, %v617_v27 }
   0xe   :  { %741 = vst [vmem:[#allocation8_spill] sm:$0xff] %v625_v31  ;;  %v627_v32 = vld [vmem:[#allocation2 + $0xd8] sm:$0xff]  ;;  %v99_v34 = vadd.f32 %v623_v30, %v621_v29  ;;  %v635_v36 = vld [vmem:[#allocation2 + $0xe0] sm:$0xff]  ;;  %v637_v37 = vld [vmem:[#allocation2 + $0xe8] sm:$0xff] }
   0xf   :  { %742 = vst [vmem:[#allocation9_spill] sm:$0xff] %v627_v32  ;;  %v102_v35 = vadd.f32 %v627_v32, %v625_v31  ;;  %v639_v38 = vld [vmem:[#allocation2 + $0x60] sm:$0xff]  ;;  %v641_v39 = vld [vmem:[#allocation2 + $0x68] sm:$0xff]  ;;  %v643_v40 = vld [vmem:[#allocation2 + $0x70] sm:$0xff]  ;;  %v105_v42 = vadd.f32 %v637_v37, %v635_v36 }
  0x10   :  { %v645_v41 = vld [vmem:[#allocation2 + $0x78] sm:$0xff]  ;;  %v81_v43 = vadd.f32 %v641_v39, %v639_v38  ;;  %v653_v45 = vld [vmem:[#allocation2 + $0xf0] sm:$0xff]  ;;  %v132_v53 = vld [vmem:[%s735_s1 + $0x28] sm:$0xff] }
  0x11   :  { %91 = vadd.xlane.f32.xlu1 %v90_v15  ;;  %v84_v44 = vadd.f32 %v645_v41, %v643_v40  ;;  %v655_v46 = vld [vmem:[#allocation2 + $0xf8] sm:$0xff]  ;;  %v133_v52 = vld [vmem:[%s735_s1 + $0x30] sm:$0xff]  ;;  %v131_v54 = vld [vmem:[%s735_s1 + $0x20] sm:$0xff] }
  0x12   :  { %67 = vadd.xlane.f32.xlu0 %v66_v16  ;;  %v108_v47 = vadd.f32 %v655_v46, %v653_v45  ;;  %v134_v48 = vld [vmem:[%s735_s1 + $0x38] sm:$0xff]  ;;  %v129_v59 = vld [vmem:[%s735_s1 + $0x10] sm:$0xff]  ;;  %v128_v60 = vld [vmem:[%s735_s1 + $0x8] sm:$0xff] }
  0x13   :  { %94 = vadd.xlane.f32.xlu2 %v93_v17  ;;  %210 = vmatpush.msra.mxu0 %v134_v48  ;;  %v130_v55 = vld [vmem:[%s735_s1 + $0x18] sm:$0xff]  ;;  %v127_v61 = vld [vmem:[%s735_s1] sm:$0xff] }
  0x15   :  { %211 = vmatpush.msra.mxu0 %v133_v52 }
  0x17   :  { %212 = vmatpush.msra.mxu0 %v132_v53 }
  0x19   :  { %97 = vadd.xlane.f32.xlu1 %v96_v24  ;;  %213 = vmatpush.msra.mxu0 %v131_v54  ;;  %v154_v24 = vadd.s32 4294967288, %v152_v8 }
  0x1a   :  { %73 = vadd.xlane.f32.xlu0 %v72_v25 }
  0x1b   :  { %76 = vadd.xlane.f32.xlu2 %v75_v26  ;;  %214 = vmatpush.msra.mxu0 %v130_v55 }
  0x1d   :  { %215 = vmatpush.msra.mxu0 %v129_v59 }
  0x1f   :  { %216 = vmatpush.msra.mxu0 %v128_v60  ;;  %v166_v60 = vadd.s32 4294967264, %v152_v8 }
  0x21   :  { %79 = vadd.xlane.f32.xlu1 %v78_v33  ;;  %217 = vmatpush.msra.mxu0 %v127_v61 }
  0x22   :  { %100 = vadd.xlane.f32.xlu0 %v99_v34 }
  0x23   :  { %103 = vadd.xlane.f32.xlu2 %v102_v35  ;;  %v158_v35 = vadd.s32 4294967280, %v152_v8 }
  0x29   :  { %106 = vadd.xlane.f32.xlu1 %v105_v42 }
  0x2a   :  { %82 = vadd.xlane.f32.xlu0 %v81_v43 }
  0x2b   :  { %85 = vadd.xlane.f32.xlu2 %v84_v44  ;;  %v162_v44 = vadd.s32 4294967272, %v152_v8 }
  0x32   :  { %109 = vadd.xlane.f32.xlu0 %v108_v47 }
  0x7c   :  { %v89_v49 = vpop.xlane.xlu1 %88 }
  0x7d   :  { %v65_v50 = vpop.xlane.xlu0 %64  ;;  %v119_v26 = vmul.f32 0.00390625, %v89_v49 }
  0x7e   :  { %v71_v51 = vpop.xlane.xlu2 %70  ;;  %v111_v33 = vmul.f32 0.00390625, %v65_v50 }
  0x7f   :  { %v113_v42 = vmul.f32 0.00390625, %v71_v51  ;;  %v182_v52 = vperm.slane %v119_v26, %v152_v8 }
  0x80   :  { %v153_v53 = vperm.slane %v111_v33, %v152_v8 }
  0x81   :  { %v159_v59 = vperm.slane %v113_v42, %v158_v35 }
  0x84   :  { %v92_v56 = vpop.xlane.xlu1 %91 }
  0x85   :  { %v68_v57 = vpop.xlane.xlu0 %67  ;;  %v120_v34 = vmul.f32 0.00390625, %v92_v56  ;;  %v170_v56 = vadd.s32 4294967256, %v152_v8 }
  0x86   :  { %v95_v58 = vpop.xlane.xlu2 %94  ;;  %v112_v25 = vmul.f32 0.00390625, %v68_v57 }
  0x87   :  { %v121_v48 = vmul.f32 0.00390625, %v95_v58  ;;  %v183_v54 = vperm.slane %v120_v34, %v154_v24 }
  0x88   :  { %v155_v43 = vperm.slane %v112_v25, %v154_v24 }
  0x89   :  { %v185_v32 = vperm.slane %v121_v48, %v158_v35  ;;  %v184_v26 = vsel %vm156_vm0, %v183_v54, %v182_v52 }
  0x8a   :  { %v157_v49 = vsel %vm156_vm0, %v155_v43, %v153_v53 }
  0x8b   :  { %v186_v35 = vsel %vm160_vm1, %v185_v32, %v184_v26 }
  0x8c   :  { %v98_v62 = vpop.xlane.xlu1 %97 }
  0x8d   :  { %v74_v63 = vpop.xlane.xlu0 %73  ;;  %v122_v55 = vmul.f32 0.00390625, %v98_v62 }
  0x8e   :  { %v77_v3 = vpop.xlane.xlu2 %76  ;;  %v114_v47 = vmul.f32 0.00390625, %v74_v63  ;;  %v174_v63 = vadd.s32 4294967248, %v152_v8 }
  0x8f   :  { %v115_v61 = vmul.f32 0.00390625, %v77_v3  ;;  %v187_v24 = vperm.slane %v122_v55, %v162_v44  ;;  %v161_v3 = vsel %vm160_vm1, %v159_v59, %v157_v49 }
  0x90   :  { %v163_v50 = vperm.slane %v114_v47, %v162_v44 }
  0x91   :  { %v188_v53 = vsel %vm164_vm2, %v187_v24, %v186_v35 }
  0x92   :  { %v165_v42 = vsel %vm164_vm2, %v163_v50, %v161_v3 }
  0x94   :  { %v80_v15 = vpop.xlane.xlu1 %79 }
  0x95   :  { %v101_v16 = vpop.xlane.xlu0 %100  ;;  %v116_v51 = vmul.f32 0.00390625, %v80_v15  ;;  %v178_v15 = vadd.s32 4294967240, %v152_v8 }
  0x96   :  { %v104_v17 = vpop.xlane.xlu2 %103  ;;  %v123_v7 = vmul.f32 0.00390625, %v101_v16  ;;  %v167_v16 = vperm.slane %v115_v61, %v166_v60 }
  0x97   :  { %v124_v62 = vmul.f32 0.00390625, %v104_v17  ;;  %v171_v43 = vperm.slane %v116_v51, %v170_v56 }
  0x98   :  { %v189_v33 = vperm.slane %v123_v7, %v166_v60  ;;  %v169_v17 = vsel %vm168_vm3, %v167_v16, %v165_v42 }
  0x99   :  { %v191_v52 = vperm.slane %v124_v62, %v170_v56  ;;  %v173_v55 = vsel %vm172_vm4, %v171_v43, %v169_v17  ;;  %v223_v56 = vld [vmem:[%s736_s2] sm:$0xf]  ;;  %s536_s2 = smov [#allocation5]  }
  0x9a   :  { %v190_v44 = vsel %vm168_vm3, %v189_v33, %v188_v53  ;;  %453 = vmatpush.msk.msra.mxu1 %vm228_vm9, %v223_v56  ;;  %s437_s8 = sshll.u32 %s536_s2, 4  ;;  %s438_s8 = int_to_ptr.vmem [resolvable:$true] %s437_s8 }
  0x9b   :  { %v192_v8 = vsel %vm172_vm4, %v191_v52, %v190_v44 }
  0x9c   :  { %v107_v25 = vpop.xlane.xlu1 %106 }
  0x9d   :  { %v83_v57 = vpop.xlane.xlu0 %82  ;;  %v125_v34 = vmul.f32 0.00390625, %v107_v25 }
  0x9e   :  { %v117_v31 = vmul.f32 0.00390625, %v83_v57  ;;  %v86_v58 = vpop.xlane.xlu2 %85 }
  0x9f   :  { %v118_v47 = vmul.f32 0.00390625, %v86_v58  ;;  %v193_v54 = vperm.slane %v125_v34, %v174_v63 }
  0xa0   :  { %v175_v48 = vperm.slane %v117_v31, %v174_v63  ;;  %v743_v63 = vlaneseq }
  0xa1   :  { %v179_v59 = vperm.slane %v118_v47, %v178_v15  ;;  %v194_v32 = vsel %vm176_vm5, %v193_v54, %v192_v8 }
  0xa2   :  { %v177_v61 = vsel %vm176_vm5, %v175_v48, %v173_v55  ;;  %v273_v58 = vshrl.u32 %v743_v63, 7 }
  0xa3   :  { %v181_v31 = vsel %vm180_vm6, %v179_v59, %v177_v61 }
  0xa4   :  { %460 = vset.pattern.permute.xlu1 %v273_v58  ;;  %v286_v26 = vadd.s32 16, %v273_v58  ;;  %v280_v24 = vadd.s32 8, %v273_v58  ;;  %v292_v54 = vadd.s32 24, %v273_v58  ;;  %v310_v59 = vadd.s32 48, %v273_v58 }
  0xa5   :  { %v110_v7 = vpop.xlane.xlu0 %109  ;;  %v316_v61 = vadd.s32 56, %v273_v58 }
  0xa6   :  { %v126_v60 = vmul.f32 0.00390625, %v110_v7  ;;  %462 = vset.pattern.permute.xlu0 %v286_v26  ;;  %461 = vset.pattern.permute.xlu2 %v280_v24  ;;  %v298_v7 = vadd.s32 32, %v273_v58 }
  0xa8   :  { %v195_v57 = vperm.slane %v126_v60, %v178_v15  ;;  %v304_v60 = vadd.s32 40, %v273_v58 }
  0xaa   :  { %v196_v49 = vsel %vm180_vm6, %v195_v57, %v194_v32 }
  0xab   :  { %v198_v50 = vsel %vm197_vm7, %v196_v49, %v181_v31 }
  0xac   :  { %452 = vmatmul.msk.f32.vlgmr.msra.gmra.mxu0 %vm199_vm8, %v198_v50 }
 0x129   :  { %v219_v51 = vpop.f32.mrf.mxu0 }
 0x12a   :  { %v222_v25 = vmax.f32 %v219_v51, 0.0 }
 0x12c   :  { %454 = vmatmul.msk.f32.vlgmr.msra.gmra.mxu1 %vm224_vm10, %v222_v25 }
 0x1a9   :  { %v249_v62 = vpop.f32.mrf.mxu1 }
 0x1aa   :  { %v455_v3 = vmul.f32 -1.442695, %v249_v62 }
 0x1ac   :  { %477 = vpow2.f32 %v455_v3 }
 0x1b2   :  { %v478_v16 = vpop.eup %477 }
 0x1b3   :  { %v255_v33 = vadd.f32 1.0, %v478_v16 }
 0x1b5   :  { %479 = vrcp.f32 %v255_v33  ;;  %v267_v15 = vand.u32 2147483648, %v255_v33  ;;  %v265_v35 = vand.u32 2147483647, %v255_v33  ;;  %vm261_vm12 = vweird.f32 %v255_v33 }
 0x1b7   :  { %v268_v53 = vor.u32 1.1754944e-38, %v267_v15  ;;  %vm266_vm14 = vcmp.eq.f32.partialorder %v265_v35, 8.507059e+37 }
 0x1bb   :  { %v480_v34 = vpop.eup %479 }
 0x1bc   :  { %v257_v42 = vmul.f32 %v480_v34, %v255_v33  ;;  %vm262_vm11 = vweird.f32 %v480_v34 }
 0x1bd   :  { %vm263_vm13 = vmor %vm261_vm12, %vm262_vm11 }
 0x1be   :  { %v258_v43 = vsub.f32 1.0, %v257_v42 }
 0x1c0   :  { %v259_v47 = vmul.f32 %v480_v34, %v258_v43 }
 0x1c2   :  { %v260_v48 = vadd.f32 %v480_v34, %v259_v47  ;;  %v745_v47 = vld [vmem:[#allocation9_spill] sm:$0xff] }
 0x1c4   :  { %v264_v52 = vsel %vm263_vm13, %v480_v34, %v260_v48 }
 0x1c5   :  { %v269_v17 = vsel %vm266_vm14, %v268_v53, %v264_v52 }
 0x1c6   :  { %v271_v44 = vperm.slane %v269_v17, 0  ;;  %v320_v55 = vperm.slane %v269_v17, 1 }
 0x1c8   :  { %288 = vperm.xlu0 %462, %v271_v44   ;;  %282 = vperm.xlu2 %461, %v271_v44  }
 0x1c9   :  { %276 = vperm.xlu1 %460, %v271_v44  }
 0x1d0   :  { %469 = vset.pattern.permute.xlu0 %v280_v24  ;;  %463 = vset.pattern.permute.xlu2 %v292_v54 }
 0x1d1   :  { %464 = vset.pattern.permute.xlu1 %v298_v7 }
 0x1d8   :  { %331 = vperm.xlu0 %469, %v320_v55   ;;  %294 = vperm.xlu2 %463, %v271_v44  }
 0x1d9   :  { %300 = vperm.xlu1 %464, %v271_v44  }
 0x1e0   :  { %474 = vset.pattern.permute.xlu0 %v310_v59  ;;  %465 = vset.pattern.permute.xlu2 %v304_v60 }
 0x1e1   :  { %466 = vset.pattern.permute.xlu1 %v310_v59 }
 0x1e8   :  { %361 = vperm.xlu0 %474, %v320_v55   ;;  %306 = vperm.xlu2 %465, %v271_v44  }
 0x1e9   :  { %312 = vperm.xlu1 %466, %v271_v44  }
 0x1f0   :  { %467 = vset.pattern.permute.xlu2 %v316_v61  ;;  %476 = vset.pattern.permute.xlu0 %v316_v61 }
 0x1f1   :  { %468 = vset.pattern.permute.xlu1 %v273_v58 }
 0x1f8   :  { %318 = vperm.xlu2 %467, %v271_v44  }
 0x1f9   :  { %325 = vperm.xlu1 %468, %v320_v55  }
 0x200   :  { %470 = vset.pattern.permute.xlu2 %v286_v26 }
 0x201   :  { %471 = vset.pattern.permute.xlu1 %v292_v54 }
 0x208   :  { %337 = vperm.xlu2 %470, %v320_v55  }
 0x209   :  { %343 = vperm.xlu1 %471, %v320_v55  }
 0x210   :  { %472 = vset.pattern.permute.xlu2 %v298_v7 }
 0x211   :  { %473 = vset.pattern.permute.xlu1 %v304_v60 }
 0x218   :  { %349 = vperm.xlu2 %472, %v320_v55  }
 0x219   :  { %355 = vperm.xlu1 %473, %v320_v55  }
 0x220   :  { %475 = vset.pattern.permute.xlu2 %v316_v61 }
 0x222   :  { %v283_v8 = vpop.permute.xlu2 %282 }
 0x223   :  { %v371_v57 = vmul.f32 %v283_v8, %v585_v11  ;;  %v372_v32 = vmul.f32 %v283_v8, %v587_v12 }
 0x225   :  { %403 = vst [vmem:[#allocation5 + $0x10] sm:$0xff] %v371_v57 }
 0x226   :  { %404 = vst [vmem:[#allocation5 + $0x18] sm:$0xff] %v372_v32 }
 0x228   :  { %367 = vperm.xlu2 %475, %v320_v55  }
 0x232   :  { %v295_v31 = vpop.permute.xlu2 %294 }
 0x233   :  { %v375_v49 = vmul.f32 %v295_v31, %v603_v20  ;;  %v376_v50 = vmul.f32 %v295_v31, %v605_v21 }
 0x235   :  { %407 = vst [vmem:[#allocation5 + $0x30] sm:$0xff] %v375_v49 }
 0x236   :  { %408 = vst [vmem:[#allocation5 + $0x38] sm:$0xff] %v376_v50 }
 0x23a   :  { %v289_v56 = vpop.permute.xlu0 %288 }
 0x23b   :  { %v373_v51 = vmul.f32 %v289_v56, %v573_v5  ;;  %v374_v25 = vmul.f32 %v289_v56, %v575_v6  ;;  %v277_v63 = vpop.permute.xlu1 %276 }
 0x23c   :  { %v369_v11 = vmul.f32 %v277_v63, %v567_v2  ;;  %v370_v12 = vmul.f32 %v277_v63, %v571_v4 }
 0x23d   :  { %405 = vst [vmem:[#allocation5 + $0x20] sm:$0xff] %v373_v51 }
 0x23e   :  { %406 = vst [vmem:[#allocation5 + $0x28] sm:$0xff] %v374_v25 }
 0x23f   :  { %401 = vst [vmem:[#allocation5] sm:$0xff] %v369_v11 }
 0x240   :  { %402 = vst [vmem:[#allocation5 + $0x8] sm:$0xff] %v370_v12 }
 0x242   :  { %v307_v58 = vpop.permute.xlu2 %306 }
 0x243   :  { %v379_v20 = vmul.f32 %v307_v58, %v617_v27  ;;  %v380_v21 = vmul.f32 %v307_v58, %v619_v28 }
 0x245   :  { %411 = vst [vmem:[#allocation5 + $0x50] sm:$0xff] %v379_v20 }
 0x246   :  { %412 = vst [vmem:[#allocation5 + $0x58] sm:$0xff] %v380_v21 }
 0x24a   :  { %v332_v26 = vpop.permute.xlu0 %331 }
 0x24b   :  { %v387_v5 = vmul.f32 %v332_v26, %v581_v9  ;;  %v388_v6 = vmul.f32 %v332_v26, %v583_v10  ;;  %v301_v24 = vpop.permute.xlu1 %300 }
 0x24c   :  { %v377_v2 = vmul.f32 %v301_v24, %v607_v22  ;;  %v378_v4 = vmul.f32 %v301_v24, %v609_v23 }
 0x24d   :  { %419 = vst [vmem:[#allocation5 + $0x90] sm:$0xff] %v387_v5 }
 0x24e   :  { %420 = vst [vmem:[#allocation5 + $0x98] sm:$0xff] %v388_v6 }
 0x24f   :  { %409 = vst [vmem:[#allocation5 + $0x40] sm:$0xff] %v377_v2 }
 0x250   :  { %410 = vst [vmem:[#allocation5 + $0x48] sm:$0xff] %v378_v4 }
 0x252   :  { %v319_v62 = vpop.permute.xlu2 %318 }
 0x253   :  { %v383_v27 = vmul.f32 %v319_v62, %v643_v40  ;;  %v384_v28 = vmul.f32 %v319_v62, %v645_v41 }
 0x255   :  { %415 = vst [vmem:[#allocation5 + $0x70] sm:$0xff] %v383_v27 }
 0x256   :  { %416 = vst [vmem:[#allocation5 + $0x78] sm:$0xff] %v384_v28 }
 0x25a   :  { %v362_v3 = vpop.permute.xlu0 %361 }
 0x25b   :  { %v397_v9 = vmul.f32 %v362_v3, %v635_v36  ;;  %v398_v10 = vmul.f32 %v362_v3, %v637_v37  ;;  %v313_v16 = vpop.permute.xlu1 %312 }
 0x25c   :  { %v381_v22 = vmul.f32 %v313_v16, %v639_v38  ;;  %v382_v23 = vmul.f32 %v313_v16, %v641_v39 }
 0x25d   :  { %429 = vst [vmem:[#allocation5 + $0xe0] sm:$0xff] %v397_v9 }
 0x25e   :  { %430 = vst [vmem:[#allocation5 + $0xe8] sm:$0xff] %v398_v10 }
 0x25f   :  { %413 = vst [vmem:[#allocation5 + $0x60] sm:$0xff] %v381_v22 }
 0x260   :  { %414 = vst [vmem:[#allocation5 + $0x68] sm:$0xff] %v382_v23 }
 0x262   :  { %v338_v33 = vpop.permute.xlu2 %337 }
 0x263   :  { %v389_v40 = vmul.f32 %v338_v33, %v589_v13  ;;  %v390_v41 = vmul.f32 %v338_v33, %v591_v14 }
 0x265   :  { %421 = vst [vmem:[#allocation5 + $0xa0] sm:$0xff] %v389_v40 }
 0x266   :  { %422 = vst [vmem:[#allocation5 + $0xa8] sm:$0xff] %v390_v41 }
 0x26b   :  { %v326_v34 = vpop.permute.xlu1 %325 }
 0x26c   :  { %v385_v36 = vmul.f32 %v326_v34, %v563_v0  ;;  %v386_v37 = vmul.f32 %v326_v34, %v565_v1 }
 0x26e   :  { %417 = vst [vmem:[#allocation5 + $0x80] sm:$0xff] %v385_v36 }
 0x26f   :  { %418 = vst [vmem:[#allocation5 + $0x88] sm:$0xff] %v386_v37 }
 0x272   :  { %v350_v38 = vpop.permute.xlu2 %349 }
 0x273   :  { %v393_v39 = vmul.f32 %v350_v38, %v621_v29  ;;  %v394_v42 = vmul.f32 %v350_v38, %v623_v30  ;;  %v744_v30 = vld [vmem:[#allocation8_spill] sm:$0xff] }
 0x275   :  { %425 = vst [vmem:[#allocation5 + $0xc0] sm:$0xff] %v393_v39 }
 0x276   :  { %426 = vst [vmem:[#allocation5 + $0xc8] sm:$0xff] %v394_v42 }
 0x27b   :  { %v344_v43 = vpop.permute.xlu1 %343 }
 0x27c   :  { %v391_v13 = vmul.f32 %v344_v43, %v599_v18  ;;  %v392_v14 = vmul.f32 %v344_v43, %v601_v19 }
 0x27e   :  { %423 = vst [vmem:[#allocation5 + $0xb0] sm:$0xff] %v391_v13 }
 0x27f   :  { %424 = vst [vmem:[#allocation5 + $0xb8] sm:$0xff] %v392_v14 }
 0x282   :  { %v368_v15 = vpop.permute.xlu2 %367 }
 0x283   :  { %v399_v0 = vmul.f32 %v368_v15, %v653_v45  ;;  %v400_v1 = vmul.f32 %v368_v15, %v655_v46 }
 0x285   :  { %431 = vst [vmem:[#allocation5 + $0xf0] sm:$0xff] %v399_v0 }
 0x286   :  { %432 = vst [vmem:[#allocation5 + $0xf8] sm:$0xff] %v400_v1 }
 0x28b   :  { %v356_v29 = vpop.permute.xlu1 %355 }
 0x28c   :  { %v395_v18 = vmul.f32 %v356_v29, %v744_v30  ;;  %v396_v19 = vmul.f32 %v356_v29, %v745_v47 }
 0x28e   :  { %427 = vst [vmem:[#allocation5 + $0xd0] sm:$0xff] %v395_v18 }
 0x28f   :  { %428 = vst [vmem:[#allocation5 + $0xd8] sm:$0xff] %v396_v19 }
 0x290   :  { %445 = dma.vmem_to_hbm [thread:$0]  %s438_s8, 4096, %s440_s11, [#allocation4], %s534_s17, %s534_s17, %s535_s18  }
 0x291   :  { %531 = dma.done.wait [#allocation4], 4096  }
 0x292   :  { %532 = vsyncadd [#allocation4], 4294963200 }
 0x293   :  { %450 = vsyncpa [#allocation3], 1 }
 0x294   :  { %451 = vsyncpa [#allocation4], 1 }

</bundles_post_ra>
